<compile_context>
chip_gen: v6e
topology: v6e:2x2x1
jax: 0.10.0
libtpu: 0.0.40
codegen_flags: <defaults>
</compile_context>

<pallas_src>
import math

import jax
import jax.numpy as jnp
from jax.experimental import pallas as pl
from jax.experimental.pallas import tpu as pltpu


def _round_up(x, n):
    return ((x + n - 1) // n) * n


def _linear_kernel(x_ref, w_ref, b_ref, o_ref):
    # x_ref: (tile, K)  w_ref: (K, N)  b_ref: (1, N) [f32]  o_ref: (tile, N)
    acc = jnp.dot(x_ref[...], w_ref[...], preferred_element_type=jnp.float32)
    o_ref[...] = (acc + b_ref[...]).astype(o_ref.dtype)


# Max packed rows per grid step: 8192 rows x 128 lanes x 4 B = 4 MiB x block.
_MAX_TILE_ROWS = 8192
_VMEM_LIMIT_BYTES = 32 * 1024 * 1024
# Below this many tokens the pallas_call fixed cost dominates -> plain XLA.
_MIN_PALLAS_TOKENS = 4096


def _choose_tiling(rows, max_tile):
    """Grid steps & row tile such that padding is at most 7 rows per step."""
    max_tile = max(8, _round_up(max_tile, 8))
    nt = max(1, pl.cdiv(rows, max_tile))
    # Give megacore (v7x: 2 TensorCores) at least two "parallel" steps when
    # there is enough work to split.
    if nt == 1 and rows >= 256:
        nt = 2
    tile = _round_up(pl.cdiv(rows, nt), 8)
    return nt, tile


def _run_linear(x_rows, w2d, b2d, tile_rows, out_dtype):
    """Row-tiled y = x @ w + b.  x_rows: (R, K) with R % tile_rows == 0."""
    rows, k = x_rows.shape
    n = w2d.shape[1]
    out_itemsize = jnp.dtype(out_dtype).itemsize
    cost = pl.CostEstimate(
        flops=2 * rows * k * n,
        transcendentals=0,
        bytes_accessed=(
            x_rows.size * x_rows.dtype.itemsize
            + w2d.size * w2d.dtype.itemsize
            + b2d.size * b2d.dtype.itemsize
            + rows * n * out_itemsize
        ),
    )
    return pl.pallas_call(
        _linear_kernel,
        out_shape=jax.ShapeDtypeStruct((rows, n), out_dtype),
        grid=(rows // tile_rows,),
        in_specs=[
            pl.BlockSpec((tile_rows, k), lambda i: (i, 0)),  # streamed rows
            pl.BlockSpec((k, n), lambda i: (0, 0)),          # resident weight
            pl.BlockSpec((1, n), lambda i: (0, 0)),          # resident bias
        ],
        out_specs=pl.BlockSpec((tile_rows, n), lambda i: (i, 0)),
        compiler_params=pltpu.CompilerParams(
            dimension_semantics=("parallel",),
            vmem_limit_bytes=_VMEM_LIMIT_BYTES,
        ),
        cost_estimate=cost,
    )(x_rows, w2d, b2d)


def project_params(x, weight, bias, *,
                   max_tile_rows=_MAX_TILE_ROWS,
                   min_pallas_tokens=_MIN_PALLAS_TOKENS):
    """y = x @ weight.T + bias  (nn.Linear forward of TFT ProjectParams).

    x:      (..., in_features)   (float32 or bfloat16)
    weight: (num_quantiles, in_features)
    bias:   (num_quantiles,)
    returns (..., num_quantiles) in x.dtype
    """
    f = x.shape[-1]
    q = weight.shape[0]
    lead_shape = x.shape[:-1]
    m = int(math.prod(lead_shape)) if lead_shape else 1

    x2d = x.reshape(m, f)                       # free: collapse leading dims
    w_t = weight.T.astype(x.dtype)              # (f, q)
    b_f32 = bias.astype(jnp.float32)

    # Tiny inputs: kernel launch + weight prep would dominate -> plain XLA.
    if m == 0 or m < min_pallas_tokens:
        y = (jnp.dot(x2d, w_t, preferred_element_type=jnp.float32)
             + b_f32).astype(x.dtype)
        return y.reshape(*lead_shape, q)

    pack = 128 // f if (f <= 128 and 128 % f == 0) else 1

    if pack > 1:
        # ---- lane-packed path: `pack` tokens per 128-lane row --------------
        rows = pl.cdiv(m, pack)
        nt, tile = _choose_tiling(rows, max_tile_rows)
        rows_total = nt * tile
        tokens_total = rows_total * pack
        if tokens_total != m:                   # single pad, only when needed
            x2d = jnp.pad(x2d, ((0, tokens_total - m), (0, 0)))
        xp = x2d.reshape(rows_total, pack * f)  # free: row-major bitcast

        # Block-diagonal weight: token slot j contracts with its own copy of
        # W^T and writes its q outputs into lanes [j*q, (j+1)*q).  The kernel
        # output (rows_total, pack*q) is therefore already the compact
        # row-major (tokens_total, q) layout -> no post-kernel lane
        # compaction pass (only a leading-row slice when padding was added).
        eye = jnp.eye(pack, dtype=x.dtype)
        w_block = jnp.einsum("ab,fq->afbq", eye, w_t).reshape(pack * f, pack * q)
        b_block = jnp.tile(b_f32, pack).reshape(1, pack * q)

        out = _run_linear(xp, w_block, b_block, tile, x.dtype)
        out = out.reshape(tokens_total, q)      # free: row-major bitcast
        if tokens_total != m:
            out = out[:m]                       # drop padded tokens only
        return out.reshape(*lead_shape, q)

    # ---- generic fallback (in_features does not divide 128) ---------------
    # Cap the x block at ~2 MiB so (tile, f) fits VMEM even for large f.
    # TODO(synk): add a K-tiled grid axis for extremely large in_features.
    row_cap = max(8, min(max_tile_rows, ((2 * 1024 * 1024) // (4 * f)) // 8 * 8))
    nt, tile = _choose_tiling(m, row_cap)
    m_total = nt * tile
    if m_total != m:
        x2d = jnp.pad(x2d, ((0, m_total - m), (0, 0)))
    b2d = b_f32.reshape(1, q)
    out = _run_linear(x2d, w_t, b2d, tile, x.dtype)
    if m_total != m:
        out = out[:m]
    return out.reshape(*lead_shape, q)


if __name__ == "__main__":
    key = jax.random.PRNGKey(0)
    kx, kw, kb, kx2 = jax.random.split(key, 4)

    # Small TFT-like shapes: (batch, seq, in_features) -> (batch, seq, Q).
    batch, seq, in_features, num_quantiles = 2, 8, 32, 9

    x = jax.random.normal(kx, (batch, seq, in_features), dtype=jnp.float32)
    bound = 1.0 / math.sqrt(in_features)
    weight = jax.random.uniform(
        kw, (num_quantiles, in_features), dtype=jnp.float32,
        minval=-bound, maxval=bound,
    )
    bias = jax.random.uniform(
        kb, (num_quantiles,), dtype=jnp.float32, minval=-bound, maxval=bound,
    )
    ref = x @ weight.T + bias

    # 1) Small TFT-sized input, forced through the Pallas kernel path.
    out = jax.block_until_ready(
        project_params(x, weight, bias, min_pallas_tokens=1))
    assert out.shape == (batch, seq, num_quantiles), out.shape
    assert jnp.allclose(out, ref, atol=1e-5, rtol=1e-5), "mismatch (small/kernel)"

    # 2) Same input through the small-input jnp fast path (default threshold).
    out_fast = jax.block_until_ready(project_params(x, weight, bias))
    assert jnp.allclose(out_fast, ref, atol=1e-5, rtol=1e-5), "mismatch (small/jnp)"

    # 3) Large input: multi-step grid, adaptive tile, token padding (m % 4 != 0).
    b2, s2 = 3, 3001                       # m = 9003 tokens -> grid=(2,), pad 21
    x_big = jax.random.normal(kx2, (b2, s2, in_features), dtype=jnp.float32)
    out_big = jax.block_until_ready(project_params(x_big, weight, bias))
    ref_big = x_big @ weight.T + bias
    assert out_big.shape == (b2, s2, num_quantiles), out_big.shape
    assert jnp.allclose(out_big, ref_big, atol=1e-4, rtol=1e-5), \
        "mismatch (large/kernel)"

    print("KERNEL_OK")
</pallas_src>

<mosaic_0001>
module attributes {stable_mosaic.version = 11 : i64} {
  func.func @_linear_kernel(%arg0: i32, %arg1: memref<8x128xf32, #tpu.memory_space<vmem>>, %arg2: memref<128x36xf32, #tpu.memory_space<vmem>>, %arg3: memref<1x36xf32, #tpu.memory_space<vmem>>, %arg4: memref<8x36xf32, #tpu.memory_space<vmem>>) attributes {dimension_semantics = [#tpu.dimension_semantics<parallel>], iteration_bounds = array<i64: 1>, scalar_prefetch = 0 : i64, scratch_operands = 0 : i64, tpu.core_type = #tpu.core_type<tc>, window_params = [{transform_indices = @transform_0, window_bounds = array<i64: 8, 128>}, {pipeline_mode = #tpu.pipeline_mode<synchronous>, transform_indices = @transform_1, window_bounds = array<i64: 128, 36>}, {pipeline_mode = #tpu.pipeline_mode<synchronous>, transform_indices = @transform_2, window_bounds = array<i64: 1, 36>}, {transform_indices = @transform_3, window_bounds = array<i64: 8, 36>}]} {
    %c0 = arith.constant 0 : index
    %c0_0 = arith.constant 0 : index
    %0 = vector.load %arg1[%c0, %c0_0] : memref<8x128xf32, #tpu.memory_space<vmem>>, vector<8x128xf32>
    %c0_1 = arith.constant 0 : index
    %c0_2 = arith.constant 0 : index
    %1 = vector.load %arg2[%c0_1, %c0_2] : memref<128x36xf32, #tpu.memory_space<vmem>>, vector<128x36xf32>
    %cst = arith.constant dense<0.000000e+00> : vector<8x36xf32>
    %2 = tpu.matmul %0, %1, %cst {dimension_numbers = #tpu.dot_dimension_numbers<[1], [0], [0], [1], [0, 0, 1, 1], [], []>} : vector<8x128xf32>, vector<128x36xf32>, vector<8x36xf32> -> vector<8x36xf32>
    %c0_3 = arith.constant 0 : index
    %c0_4 = arith.constant 0 : index
    %3 = vector.load %arg3[%c0_3, %c0_4] : memref<1x36xf32, #tpu.memory_space<vmem>>, vector<1x36xf32>
    %4 = vector.broadcast %3 : vector<1x36xf32> to vector<8x36xf32>
    %5 = arith.addf %2, %4 : vector<8x36xf32>
    %c0_5 = arith.constant 0 : index
    %c0_6 = arith.constant 0 : index
    %6 = vector.load %arg4[%c0_5, %c0_6] : memref<8x36xf32, #tpu.memory_space<vmem>>, vector<8x36xf32>
    tpu.vector_store %arg4[%c0_5, %c0_6], %5 {strides = array<i32>} : memref<8x36xf32, #tpu.memory_space<vmem>>, vector<8x36xf32>,
    return
  }
  func.func @transform_0(%arg0: i32) -> (i32, i32) {
    %c0_i32 = arith.constant 0 : i32
    %c0_i32_0 = arith.constant 0 : i32
    return %arg0, %c0_i32 : i32, i32
  }
  func.func @transform_1(%arg0: i32) -> (i32, i32) {
    %c0_i32 = arith.constant 0 : i32
    %c0_i32_0 = arith.constant 0 : i32
    %c0_i32_1 = arith.constant 0 : i32
    return %c0_i32, %c0_i32_0 : i32, i32
  }
  func.func @transform_2(%arg0: i32) -> (i32, i32) {
    %c0_i32 = arith.constant 0 : i32
    %c0_i32_0 = arith.constant 0 : i32
    %c0_i32_1 = arith.constant 0 : i32
    return %c0_i32, %c0_i32_0 : i32, i32
  }
  func.func @transform_3(%arg0: i32) -> (i32, i32) {
    %c0_i32 = arith.constant 0 : i32
    %c0_i32_0 = arith.constant 0 : i32
    return %arg0, %c0_i32 : i32, i32
  }
}

</mosaic_0001>

<bundles_post_ra>
// kernel: tpu_custom_call.1
= control target key start
LH: loop header
LB: loop body
LE: loop exit
PB: predicated region body
PF: predicated region fallthrough
CT: control target
= control target key end

     0   :  { %v203_v1 = vmov 0.0   ;;  %vm204_vm0 = vmmov 0   ;;  %s283_s0 = inlined_call_operand.vmem [shape: f32[8,128], index: 0, kind: input, shape index: {}]   ;;  %s284_s1 = inlined_call_operand.vmem [shape: f32[128,36], index: 1, kind: input, shape index: {}]   ;;  %s285_s2 = inlined_call_operand.vmem [shape: f32[1,36], index: 2, kind: input, shape index: {}]   ;;  %s286_s3 = inlined_call_operand.hbm [shape: f32[8,36], index: 3, kind: output, shape index: {}]  }
   0x1   :  { %v31_v0 = vld [vmem:[%s284_s1 + $0x78] sm:$0xff]  ;;  %143 = vmatprep.subr.mxu0 %v203_v1  ;;  %v30_v2 = vld [vmem:[%s284_s1 + $0x70] sm:$0xff]  ;;  %175 = vmatprep.mubr.msk.f32.mxu0 %vm204_vm0, %v203_v1  ;;  %v29_v3 = vld [vmem:[%s284_s1 + $0x68] sm:$0xff] }
   0x2   :  { %144 = vmatpush3.msra.mxu0 %v31_v0  ;;  %v28_v4 = vld [vmem:[%s284_s1 + $0x60] sm:$0xff] }
   0x3   :  { %145 = vmatprep.subr.mxu0 %v203_v1 }
   0x4   :  { %146 = vmatpush3.msra.mxu0 %v30_v2 }
   0x5   :  { %147 = vmatprep.subr.mxu0 %v203_v1 }
   0x6   :  { %148 = vmatpush3.msra.mxu0 %v29_v3 }
   0x7   :  { %8 = vsyncpa [#allocation3], 0  ;;  %149 = vmatprep.subr.mxu0 %v203_v1  ;;  %v27_v5 = vld [vmem:[%s284_s1 + $0x58] sm:$0xff]  ;;  %v26_v6 = vld [vmem:[%s284_s1 + $0x50] sm:$0xff]  ;;  %s205_s21 = smov [#allocation2]   ;;  %vm109_vm1 = vcmask 293888  }
   0x8   :  { %150 = vmatpush3.msra.mxu0 %v28_v4  ;;  %v25_v7 = vld [vmem:[%s284_s1 + $0x48] sm:$0xff]  ;;  %v24_v8 = vld [vmem:[%s284_s1 + $0x40] sm:$0xff]  ;;  %v23_v9 = vld [vmem:[%s284_s1 + $0x38] sm:$0xff]  ;;  %s117_s22 = sshll.u32 %s205_s21, 4  ;;  %s118_s22 = int_to_ptr.vmem [resolvable:$true] %s117_s22 }
   0x9   :  { %151 = vmatprep.subr.mxu0 %v203_v1  ;;  %v22_v10 = vld [vmem:[%s284_s1 + $0x30] sm:$0xff]  ;;  %v21_v11 = vld [vmem:[%s284_s1 + $0x28] sm:$0xff]  ;;  %v20_v12 = vld [vmem:[%s284_s1 + $0x20] sm:$0xff]  ;;  %p186_p1 = scmp.lt.s32.totalorder %s118_s22, %s118_s22 }
   0xa   :  { %152 = vmatpush3.msra.mxu0 %v27_v5  ;;  %v19_v13 = vld [vmem:[%s284_s1 + $0x18] sm:$0xff]  ;;  %v18_v14 = vld [vmem:[%s284_s1 + $0x10] sm:$0xff]  ;;  %v17_v15 = vld [vmem:[%s284_s1 + $0x8] sm:$0xff] }
   0xb   :  { %153 = vmatprep.subr.mxu0 %v203_v1  ;;  %v16_v16 = vld [vmem:[%s284_s1] sm:$0xff]  ;;  %s181_s1 = scalar_lea.vmem %s118_s22, 128 }
   0xc   :  { %154 = vmatpush3.msra.mxu0 %v26_v6  ;;  %v15_v17 = vld [vmem:[%s283_s0] sm:$0xff]  ;;  %p182_p0 = scmp.ne.s32.totalorder %s118_s22, %s181_s1  ;;  %p187_p2 = scmp.lt.s32.totalorder %s181_s1, %s181_s1 }
   0xd   :  { %155 = vmatprep.subr.mxu0 %v203_v1  ;;  %v125_v18 = vld [vmem:[%s285_s2] ss:$0 sm:$0xff] }
   0xe   :  { %156 = vmatpush3.msra.mxu0 %v25_v7  ;;  %p188_p3 = por %p187_p2, %p186_p1 }
   0xf   :  { %157 = vmatprep.subr.mxu0 %v203_v1 }
  0x10   :  { %158 = vmatpush3.msra.mxu0 %v24_v8  ;;  %p189_p4 = pnand %p188_p3, %p182_p0 }
  0x11   :  { %159 = vmatprep.subr.mxu0 %v203_v1 }
  0x12   :  { %160 = vmatpush3.msra.mxu0 %v23_v9 }
  0x13   :  { %161 = vmatprep.subr.mxu0 %v203_v1 }
  0x14   :  { %162 = vmatpush3.msra.mxu0 %v22_v10 }
  0x15   :  { %163 = vmatprep.subr.mxu0 %v203_v1 }
  0x16   :  { %164 = vmatpush3.msra.mxu0 %v21_v11 }
  0x17   :  { %165 = vmatprep.subr.mxu0 %v203_v1 }
  0x18   :  { %166 = vmatpush3.msra.mxu0 %v20_v12 }
  0x19   :  { %167 = vmatprep.subr.mxu0 %v203_v1 }
  0x1a   :  { %168 = vmatpush3.msra.mxu0 %v19_v13 }
  0x1b   :  { %169 = vmatprep.subr.mxu0 %v203_v1 }
  0x1c   :  { %170 = vmatpush3.msra.mxu0 %v18_v14 }
  0x1d   :  { %171 = vmatprep.subr.mxu0 %v203_v1 }
  0x1e   :  { %172 = vmatpush3.msra.mxu0 %v17_v15 }
  0x1f   :  { %173 = vmatprep.subr.mxu0 %v203_v1 }
  0x20   :  { %174 = vmatpush3.msra.mxu0 %v16_v16 }
  0x21   :  { %176 = vmatmul.mubr.f32.vlgmr.msra.gmra.mxu0 %v15_v17 }
  0xe1   :  { %v105_v19 = vpop.f32.mrf.mxu0 }
  0xe2   :  { %v106_v20 = vadd.f32 %v125_v18, %v105_v19 }
  0xe3   :  { %v177_v21 = vpop.f32.mrf.mxu0 }
  0xe4   :  { %110 = vst.msk [vmem:[#allocation2] sm:$0xff] %vm109_vm1, %v106_v20 }
  0xe5   :  { %192 = shalt.err (!%p189_p4)
}
  0xe6   :  { %120 = dma.vmem_to_hbm [thread:$0]  %s118_s22, 128, %s286_s3, [#allocation3]  }
  0xe7   :  { %201 = dma.done.wait [#allocation3], 128  }
  0xe8   :  { %202 = vsyncadd [#allocation3], 4294967168 }
  0xe9   :  { %124 = vsyncpa [#allocation3], 1 }

</bundles_post_ra>
